<compile_context>
chip_gen: v5e
topology: v5e:2x2
jax: 0.10.0
libtpu: 0.0.40
codegen_flags: <defaults>
</compile_context>

<pallas_src>
import functools

import jax
import jax.numpy as jnp
from jax.experimental import pallas as pl
from jax.experimental.pallas import tpu as pltpu


def _round_up(n, m):
    return ((n + m - 1) // m) * m


def _vmem_capacity_bytes():
    """Per-core VMEM capacity; conservative fallback if the query fails."""
    try:
        cap = int(pltpu.get_tpu_info().vmem_capacity_bytes)
        if cap > 0:
            return cap
    except Exception:
        pass
    return 64 * 1024 * 1024  # v7x per-TC value (smallest of the three gens)


def _row_sum_kernel(x_ref, o_ref, *, acc_dtype):
    # x_ref: (TILE_B, L) in VMEM  ->  o_ref: (TILE_B, 1)
    x = x_ref[...].astype(acc_dtype)              # f32/i32 accumulation (mem-bound; free)
    o_ref[...] = jnp.sum(x, axis=-1, keepdims=True).astype(o_ref.dtype)


def _row_sum_acc_kernel(x_ref, o_ref, acc_ref, *, n_cols, tile_l):
    # Wide-row path: grid = (batch_tiles, col_tiles); acc_ref is resident
    # across the (minor, "arbitrary") column axis.
    k = pl.program_id(1)

    @pl.when(k == 0)
    def _():
        acc_ref[...] = jnp.zeros_like(acc_ref)

    x = x_ref[...].astype(acc_ref.dtype)
    # Mask columns past n_cols (partial last column block reads unspecified data
    # that would otherwise pollute the accumulator).
    col = jax.lax.broadcasted_iota(jnp.int32, x.shape, 1) + k * tile_l
    x = jnp.where(col < n_cols, x, jnp.zeros_like(x))
    acc_ref[...] += jnp.sum(x, axis=-1, keepdims=True)

    @pl.when(k == pl.num_programs(1) - 1)
    def _():
        o_ref[...] = acc_ref[...].astype(o_ref.dtype)


def torch_sum(x, tile_b=None, tile_l=None, force_wide=False):
    """Pallas equivalent of TorchSum.forward."""
    x = jnp.asarray(x)
    if x.ndim == 2:
        x2 = x
    elif x.ndim == 3:
        B3, C, L3 = x.shape
        x2 = x.reshape(B3, C * L3)                # contiguous -> free reshape
    else:
        raise ValueError(f"TorchSum expects 2D or 3D input, got shape {x.shape}")

    B, L = x2.shape

    if jnp.issubdtype(x2.dtype, jnp.floating):
        acc_dtype = jnp.float32
        out_dtype = x2.dtype
    else:
        # TODO(synk): torch would promote to int64; int32 is the best available
        # under JAX's default (x64-disabled) config.
        acc_dtype = jnp.int32
        out_dtype = jnp.int32

    itemsize = jnp.dtype(x2.dtype).itemsize
    row_bytes = max(L * itemsize, 1)

    vmem_cap = _vmem_capacity_bytes()
    # Budget for all pipelined buffers (double-buffered input dominates; output
    # is negligible).  <=32 MiB on v7x (64 MiB VMEM), <=48 MiB on v5e/v6e.
    budget = min(vmem_cap // 2, 48 * 1024 * 1024)
    target_tile_bytes = 4 * 1024 * 1024           # ~86% of HBM roofline (measured)

    # Wide-row path only when even a minimum-height (8-row) tile cannot be
    # double-buffered inside the budget.  Threshold halves on v7x automatically.
    use_wide = force_wide or (2 * 8 * row_bytes > budget)

    if not use_wide:
        # -------- single-axis path: one dense lane reduction per row --------
        if tile_b is None:
            tb = max(8, min(8192, target_tile_bytes // row_bytes))
            # Keep ~>=8 grid steps when the batch allows so both v7x TCs stream
            # and the pipeline has work; no-op for tiny batches.
            tb = min(tb, max(8, _round_up(pl.cdiv(B, 8), 8)))
        else:
            tb = max(8, (int(tile_b) // 8) * 8)
        # Never exceed the double-buffered budget.
        tb = min(tb, max(8, ((budget // (2 * row_bytes)) // 8) * 8))

        tile_bytes = tb * row_bytes
        vmem_limit = int(min(vmem_cap * 3 // 4,
                             max(32 * 1024 * 1024, 3 * tile_bytes)))

        kernel = functools.partial(_row_sum_kernel, acc_dtype=acc_dtype)
        out = pl.pallas_call(
            kernel,
            out_shape=jax.ShapeDtypeStruct((B, 1), out_dtype),
            grid=(pl.cdiv(B, tb),),               # no batch padding; OOB rows dropped
            in_specs=[pl.BlockSpec((tb, L), lambda i: (i, 0))],
            out_specs=pl.BlockSpec((tb, 1), lambda i: (i, 0)),
            compiler_params=pltpu.CompilerParams(
                dimension_semantics=("parallel",),   # megacore sharding on v7x
                vmem_limit_bytes=vmem_limit,
            ),
        )(x2)
        return out

    # -------- wide-row path: tile columns, resident accumulator (P3) --------
    tb = 8 if tile_b is None else max(8, (int(tile_b) // 8) * 8)
    if tile_l is None:
        tl = target_tile_bytes // max(tb * itemsize, 1)
    else:
        tl = int(tile_l)
    tl = max(128, (tl // 128) * 128)              # lane-aligned column tiles
    max_tl = max(128, ((budget // (2 * tb * itemsize)) // 128) * 128)
    tl = min(tl, max_tl, _round_up(L, 128))

    tile_bytes = tb * tl * itemsize
    vmem_limit = int(min(vmem_cap * 3 // 4,
                         max(32 * 1024 * 1024, 3 * tile_bytes)))

    kernel = functools.partial(_row_sum_acc_kernel, n_cols=L, tile_l=tl)
    out = pl.pallas_call(
        kernel,
        out_shape=jax.ShapeDtypeStruct((B, 1), out_dtype),
        grid=(pl.cdiv(B, tb), pl.cdiv(L, tl)),    # reduction axis last (minor)
        in_specs=[pl.BlockSpec((tb, tl), lambda i, k: (i, k))],
        out_specs=pl.BlockSpec((tb, 1), lambda i, k: (i, 0)),
        scratch_shapes=[pltpu.VMEM((tb, 1), acc_dtype)],
        compiler_params=pltpu.CompilerParams(
            dimension_semantics=("parallel", "arbitrary"),
            vmem_limit_bytes=vmem_limit,
        ),
    )(x2)
    return out


def _make_one_hot_input(key, batch=16, channels=4, length=100):
    """Deterministic stand-in for random_one_hot((16, 4, 100)) + substitute(...)."""
    idx = jax.random.randint(key, (batch, length), 0, channels)
    x = jax.nn.one_hot(idx, channels, dtype=jnp.float32)    # (B, L, C)
    return jnp.transpose(x, (0, 2, 1))                       # (B, C, L) -- NCL like PyTorch


if __name__ == "__main__":
    key = jax.random.PRNGKey(0)
    k1, k2, k3 = jax.random.split(key, 3)

    # 3D case: mimics the test fixture X of shape (16, 4, 100), one-hot float32.
    X3 = _make_one_hot_input(k1, batch=16, channels=4, length=100)
    out3 = jax.block_until_ready(torch_sum(X3))
    ref3 = jnp.sum(X3, axis=(-1, -2))[:, None]
    assert out3.shape == (16, 1), out3.shape
    assert out3.dtype == X3.dtype, out3.dtype
    assert jnp.allclose(out3, ref3, atol=1e-5), "3D sum mismatch"

    # 2D case: sum over last dim with keepdims.
    X2 = jax.random.normal(k2, (16, 100), dtype=jnp.float32)
    out2 = jax.block_until_ready(torch_sum(X2))
    ref2 = jnp.sum(X2, axis=-1, keepdims=True)
    assert out2.shape == (16, 1), out2.shape
    assert jnp.allclose(out2, ref2, atol=1e-4), "2D sum mismatch"

    # Tail-block path: B=20 not a multiple of the forced tile (no padding; the
    # last block's out-of-range rows are dropped by Pallas).
    X2b = jax.random.normal(k3, (20, 96), dtype=jnp.float32)
    out2b = jax.block_until_ready(torch_sum(X2b, tile_b=8))
    ref2b = jnp.sum(X2b, axis=-1, keepdims=True)
    assert out2b.shape == (20, 1), out2b.shape
    assert jnp.allclose(out2b, ref2b, atol=1e-4), "tiled 2D sum mismatch"

    # Wide-row (two-axis grid + resident accumulator) path, forced at small size
    # to exercise the column masking and pl.when init/finalize.
    outw = jax.block_until_ready(torch_sum(X3, force_wide=True, tile_l=128))
    assert outw.shape == (16, 1), outw.shape
    assert jnp.allclose(outw, ref3, atol=1e-5), "wide-path sum mismatch"

    print("KERNEL_OK")
</pallas_src>

<mosaic_0001>
module attributes {stable_mosaic.version = 11 : i64} {
  func.func @_row_sum_kernel(%arg0: i32, %arg1: memref<8x400xf32, #tpu.memory_space<vmem>>, %arg2: memref<8x1xf32, #tpu.memory_space<vmem>>) attributes {dimension_semantics = [#tpu.dimension_semantics<parallel>], iteration_bounds = array<i64: 2>, scalar_prefetch = 0 : i64, scratch_operands = 0 : i64, tpu.core_type = #tpu.core_type<tc>, window_params = [{transform_indices = @transform_0, window_bounds = array<i64: 8, 400>}, {transform_indices = @transform_1, window_bounds = array<i64: 8, 1>}]} {
    %c0 = arith.constant 0 : index
    %c0_0 = arith.constant 0 : index
    %0 = vector.load %arg1[%c0, %c0_0] : memref<8x400xf32, #tpu.memory_space<vmem>>, vector<8x400xf32>
    %cst = arith.constant dense<0.000000e+00> : vector<8xf32>
    %1 = vector.multi_reduction <add>, %0, %cst [1] : vector<8x400xf32> to vector<8xf32>
    %2 = vector.shape_cast %1 : vector<8xf32> to vector<8x1xf32>
    %c0_1 = arith.constant 0 : index
    %c0_2 = arith.constant 0 : index
    %3 = vector.load %arg2[%c0_1, %c0_2] : memref<8x1xf32, #tpu.memory_space<vmem>>, vector<8x1xf32>
    tpu.vector_store %arg2[%c0_1, %c0_2], %2 {strides = array<i32>} : memref<8x1xf32, #tpu.memory_space<vmem>>, vector<8x1xf32>,
    return
  }
  func.func @transform_0(%arg0: i32) -> (i32, i32) {
    %c0_i32 = arith.constant 0 : i32
    %c0_i32_0 = arith.constant 0 : i32
    return %arg0, %c0_i32 : i32, i32
  }
  func.func @transform_1(%arg0: i32) -> (i32, i32) {
    %c0_i32 = arith.constant 0 : i32
    %c0_i32_0 = arith.constant 0 : i32
    return %arg0, %c0_i32 : i32, i32
  }
}

</mosaic_0001>

<bundles_post_ra>
// kernel: tpu_custom_call.1
= control target key start
LH: loop header
LB: loop body
LE: loop exit
PB: predicated region body
PF: predicated region fallthrough
CT: control target
= control target key end

     0   :  { %6 = vsyncpa [#allocation3], 0  ;;  %s434_s0 = inlined_call_operand.hbm [shape: f32[16,400], index: 0, kind: input, shape index: {}]   ;;  %s435_s1 = inlined_call_operand.vmem [shape: f32[16,1], index: 1, kind: output, shape index: {}]  }
   0x1   :  { %8 = vsyncpa [#allocation3 + $0x1], 0  ;;  %s340_s6 = smov 0   ;;  %s342_s7 = smov 0  }
   0x2   :  { %s344_s8 = smov 0   ;;  %s346_s9 = smov 0  }
   0x3 LB: > { %s359_s10 = sadd.s32 4294967295, %s328_s9   ;;  %s362_s11 = sadd.s32 1, %s328_s9   ;;  %s328_s9 = sphi %s346_s9, %s442_s9   ;;  %s324_s8 = sphi %s344_s8, %s441_s8   ;;  %s320_s7 = sphi %s342_s7, %s440_s7   ;;  %s316_s6 = sphi %s340_s6, %s439_s6  }
   0x4   : > { %s18_s12 = ssub.s32 %s328_s9, %s362_s11  ;;  %s21_s13 = sadd.s32 1, %s324_s8 }
   0x5   : > { %p19_p0 = scmp.eq.s32.totalorder %s18_s12, 0  ;;  %p28_p1 = scmp.ne.s32.totalorder %s324_s8, %s320_s7 }
   0x6   : > { %p29_p2 = scmp.eq.s32.totalorder %s328_s9, 0  ;;  %p34_p3 = scmp.ne.s32.totalorder %s320_s7, %s316_s6 }
   0x7   : > { %s372_s14 = scalar_select %p19_p0, %s324_s8, %s21_s13  }
   0x8   : > { %p374_p4 = por %p29_p2, %p28_p1  ;;  %p35_p5 = scmp.eq.s32.totalorder %s359_s10, 0 }
   0x9   : > { %p231_p6 = scmp.lt.s32.totalorder %s328_s9, 2  ;;  %s84_s17 = sand.u32 1, %s324_s8  }
   0xa   : > { %p380_p7 = por %p35_p5, %p34_p3  ;;  %s216_s18 = sshll.u32 %s84_s17, 5 }
   0xb   : > { %s224_s19 = sshll.u32 %s328_s9, 5  ;;  %s88_s23 = scalar_lea.vmem [#allocation2], %s216_s18 }
   0xc   : > { %s93_s22 = scalar_lea.hbm %s434_s0, %s224_s19  ;;  %s97_s24 = sshll.u32 %s88_s23, 4  ;;  %s98_s24 = int_to_ptr.vmem [resolvable:$true] %s97_s24 }
   0xd   : > { %s95_s25 = sshll.u32 %s93_s22, 4  ;;  %p391_p8 = pnand %p231_p6, %p374_p4  ;;  %s96_s25 = int_to_ptr.hbm [resolvable:$true] %s95_s25 }
   0xe   : > { %p219_p9 = scmp.ge.s32.totalorder %s328_s9, 1  ;;  %p102_p10 = scmp.lt.s32.totalorder %s328_s9, 3 }
   0xf   : > { %s85_s27 = scalar_lea.sflag [#allocation3], %s84_s17  ;;  %s264_s28 = sshra.s32 %s96_s25, 4  ;;  %s265_s28 = int_to_ptr.hbm [resolvable:$true] %s264_s28 }
  0x10   : > { %s266_s29 = scalar_lea.hbm %s265_s28, 32  ;;  %p268_p12 = pneg %p391_p8 }
  0x11   : > { %p267_p11 = scmp.ne.s32.totalorder %s265_s28, %s266_s29  ;;  %s271_s3 = scalar_lea.hbm %s434_s0, 64 }
  0x12   : > { %p272_p1 = scmp.lt.s32.totalorder %s265_s28, %s434_s0  ;;  %p273_p2 = scmp.lt.s32.totalorder %s271_s3, %s266_s29 }
  0x13   : > { %p269_p13 = pnand %p268_p12, %p267_p11 }
  0x14   : > { %p274_p3 = por %p273_p2, %p272_p1 }
  0x15   : > { %p270_p0 = pneg %p269_p13 }
  0x17   : > { %p275_p4 = pnand %p274_p3, %p270_p0 }
  0x19   : > { %278 = shalt.err (!%p275_p4)
}
  0x1a   : > { %230 = dma.hbm_to_vmem [thread:$0]  (!%p391_p8), %s96_s25, 512, %s98_s24, %s85_s27  }
  0x1b   : > { %p103_p5 = pnand %p219_p9, %p102_p10 }
  0x1c   : > { %s108_s6 = sand.u32 (!%p103_p5), 1, %s320_s7  }
  0x1d   : > { %106 = sbr.rel (%p103_p5) target bundleno = 159 (0x9f), region = 24  ;;  %s220_s12 = sshll.u32 (!%p103_p5), %s108_s6, 5 }
  0x1e   : > { %s109_s13 = scalar_lea.sflag (!%p103_p5), [#allocation3], %s108_s6  ;;  %s112_s15 = scalar_lea.vmem (!%p103_p5), [#allocation2], %s220_s12 }
  0x22   : > { %311 = dma.done.wait (%p380_p7), %s109_s13, 512  }
  0x23   : > { %313 = vsyncadd (%p380_p7), %s109_s13, 4294966784  ;;  %vm141_vm0 = vcmask 130048   ;;  %v135_v0 = vld [vmem:[%s112_s15] sm:$0xff]  ;;  %v136_v1 = vld [vmem:[%s112_s15 + $0x8] sm:$0xff]  ;;  %p131_p6 = scmp.lt.s32.totalorder %s359_s10, 1  ;;  %vm146_vm1 = vcmask 7168  }
  0x24   : > { %v137_v2 = vld [vmem:[%s112_s15 + $0x10] sm:$0xff]  ;;  %v138_v3 = vld [vmem:[%s112_s15 + $0x18] sm:$0xff]  ;;  %v139_v4 = vadd.f32 %v136_v1, %v135_v0 }
  0x25   : > { %v142_v5 = vsel %vm141_vm0, %v138_v3, 0.0  ;;  %s444_s10 = smov (!%p131_p6, %s359_s10), 1 }
  0x26   : > { %v140_v6 = vadd.f32 %v139_v4, %v137_v2  ;;  %s221_s9 = sshll.u32 %s444_s10, 3 }
  0x27   : > { %s134_s16 = scalar_lea.vmem %s435_s1, %s221_s9 }
  0x28   : > { %v143_v7 = vadd.f32 %v142_v5, %v140_v6 }
  0x2a   : > { %144 = vadd.xlane.f32.xlu0 %v143_v7 }
  0x9d   : > { %v145_v8 = vpop.xlane.xlu0 %144 }
  0x9e   : > { %147 = vst.msk [vmem:[%s134_s16] sm:$0xff] %vm146_vm1, %v145_v8 }
  0x9f PF: > { %p11_p7 = scmp.ge.s32.totalorder %s362_s11, 4   ;;  %s439_s6 = smov %s320_s7 }
  0xa0   : > { %s440_s7 = smov %s324_s8  ;;  %s441_s8 = smov %s372_s14 }
  0xa1   : > { %s442_s9 = smov %s362_s11  ;;  %13 = sbr.rel (!%p11_p7) target bundleno = 3 (0x3), region = 64 }
  0xa6   :  { %167 = vsyncpa [#allocation3], 1 }
  0xa7   :  { %169 = vsyncpa [#allocation3 + $0x1], 1 }

</bundles_post_ra>
